<compile_context>
chip_gen: v7x
topology: tpu7x:2x2x1
jax: 0.10.0
libtpu: 0.0.40
codegen_flags: <defaults>
</compile_context>

<pallas_src>
import math
from functools import partial

import jax
import jax.numpy as jnp
import numpy as np
from jax.experimental import pallas as pl
from jax.experimental.pallas import tpu as pltpu

LANE = 128
SUBLANE = 8


def _b5iou_sum_kernel(*refs, eps, has_weight, needs_mask, n_valid):
    """One grid step: (8, rows, 128) slab of stacked pred/target coords.

    Rows 0-3 of the leading axis are pred [x1,y1,x2,y2]; rows 4-7 are the
    target coords.  The (optionally weighted / masked) per-box loss is
    accumulated elementwise into a (rows, 128) VMEM scratch; the cross-lane
    reduction runs only once, in the final grid step of each core's slab.
    """
    if has_weight:
        boxes_ref, w_ref, out_ref, acc_ref = refs
    else:
        boxes_ref, out_ref, acc_ref = refs
        w_ref = None

    i = pl.program_id(1)

    @pl.when(i == 0)
    def _():
        acc_ref[...] = jnp.zeros_like(acc_ref)

    px1 = boxes_ref[0]  # (rows, 128), lane-dense
    py1 = boxes_ref[1]
    px2 = boxes_ref[2]
    py2 = boxes_ref[3]
    tx1 = boxes_ref[4]
    ty1 = boxes_ref[5]
    tx2 = boxes_ref[6]
    ty2 = boxes_ref[7]

    # bbox_overlaps(..., is_aligned=True, mode='iou', eps=eps)
    area_p = (px2 - px1) * (py2 - py1)
    area_t = (tx2 - tx1) * (ty2 - ty1)
    lt_x = jnp.maximum(px1, tx1)
    lt_y = jnp.maximum(py1, ty1)
    rb_x = jnp.minimum(px2, tx2)
    rb_y = jnp.minimum(py2, ty2)
    iw = jnp.maximum(rb_x - lt_x, 0.0)
    ih = jnp.maximum(rb_y - lt_y, 0.0)
    overlap = iw * ih
    union = jnp.maximum(area_p + area_t - overlap, eps)
    ious = overlap / union

    # b5 iou loss (elementwise; the exp goes to the EUP slot)
    log16 = math.log(16.0)
    c1 = 1.0 / log16 / (16.0 ** 0.75)
    c2 = 2.0 - 2.0 / log16
    pow16_iou = jnp.exp(ious * log16)  # 16 ** iou
    loss = jnp.where(ious < 0.75, 1.0 - ious, c1 * pow16_iou - 2.0 * ious + c2)

    if has_weight:
        loss = loss * w_ref[...]
    elif needs_mask:
        # Zero out padded boxes without streaming a mask/weight from HBM.
        rows = acc_ref.shape[0]
        blk = pl.program_id(0) * pl.num_programs(1) + i
        row0 = blk * rows
        row_ids = jax.lax.broadcasted_iota(jnp.int32, (rows, LANE), 0)
        lane_ids = jax.lax.broadcasted_iota(jnp.int32, (rows, LANE), 1)
        gidx = (row0 + row_ids) * LANE + lane_ids
        loss = jnp.where(gidx < n_valid, loss, 0.0)

    acc_ref[...] += loss  # lane/sublane-wise accumulate (no per-step XLU reduce)

    @pl.when(i == pl.num_programs(1) - 1)
    def _():
        col = jnp.sum(acc_ref[...], axis=0, keepdims=True)  # (1, 128)
        out_ref[0] = jnp.sum(col, axis=1, keepdims=True)    # (1, 1) per-core partial


def _round_up(x, k):
    return ((x + k - 1) // k) * k


def _choose_tiling(m_raw, max_rows):
    """Pick (cores, rows_per_block, blocks_per_core, m_padded).

    The leading 'cores' grid axis is marked "parallel" so it is sharded across
    TensorCores on megacore parts; on 1-TC chips it runs sequentially.
    rows_per_block is a multiple of 8 (sublane-dense) unless the whole array
    is a single block (block dims == full dims is legal).
    """
    if m_raw <= SUBLANE:
        return 1, m_raw, 1, m_raw           # whole array as one block
    cores = 2
    per_core = -(-m_raw // cores)
    rows = min(max_rows, _round_up(per_core, SUBLANE))
    blocks = -(-per_core // rows)
    return cores, rows, blocks, cores * blocks * rows


def b5iou_loss_pallas(decode_pred, decode_target, weight=None, *,
                      eps=1e-6, reduction="mean", avg_factor=None,
                      loss_weight=1.0, max_rows_per_block=512):
    """Weighted, reduced B5-IoU loss. decode_pred / decode_target: (N, 4)."""
    n = decode_pred.shape[0]
    assert decode_pred.shape == decode_target.shape == (n, 4)
    if reduction not in ("mean", "sum"):
        # TODO(synk): reduction='none' needs a per-element (N,) output path.
        raise NotImplementedError("only 'mean' / 'sum' reductions implemented in the kernel")

    # --- tiling -------------------------------------------------------------
    m_raw = -(-n // LANE)                    # number of 128-box lane rows
    cores, rows, blocks_per_core, m = _choose_tiling(m_raw, max_rows_per_block)
    n_pad = m * LANE

    # --- planar, lane-dense layout: (8, m, 128) ------------------------------
    # TODO(synk): producing boxes coords-major upstream would remove this one
    # extra HBM relayout pass outside the kernel.
    pred = jnp.asarray(decode_pred, jnp.float32)
    tgt = jnp.asarray(decode_target, jnp.float32)
    boxes = jnp.concatenate([pred, tgt], axis=1)          # (n, 8)
    if n_pad != n:
        boxes = jnp.pad(boxes, ((0, n_pad - n), (0, 0)))  # zero-area pad boxes
    planar = boxes.T.reshape(8, m, LANE)

    has_weight = weight is not None
    needs_mask = (n_pad != n) and not has_weight          # in-kernel iota mask

    inputs = [planar]
    in_specs = [pl.BlockSpec((8, rows, LANE),
                             lambda c, i: (0, c * blocks_per_core + i, 0))]
    if has_weight:
        w = jnp.asarray(weight, jnp.float32).reshape(n)
        if n_pad != n:
            w = jnp.pad(w, (0, n_pad - n))                # padded boxes weigh 0
        inputs.append(w.reshape(m, LANE))
        in_specs.append(pl.BlockSpec((rows, LANE),
                                     lambda c, i: (c * blocks_per_core + i, 0)))

    kernel = partial(_b5iou_sum_kernel, eps=float(eps), has_weight=has_weight,
                     needs_mask=needs_mask, n_valid=n)

    partials = pl.pallas_call(
        kernel,
        out_shape=jax.ShapeDtypeStruct((cores, 1, 1), jnp.float32),
        grid_spec=pltpu.PrefetchScalarGridSpec(
            num_scalar_prefetch=0,
            grid=(cores, blocks_per_core),
            in_specs=in_specs,
            out_specs=pl.BlockSpec((1, 1, 1), lambda c, i: (c, 0, 0)),
            scratch_shapes=[pltpu.VMEM((rows, LANE), jnp.float32)],
        ),
        compiler_params=pltpu.CompilerParams(
            dimension_semantics=("parallel", "arbitrary")),
    )(*inputs)

    total = jnp.sum(partials)                             # sum per-core partials
    if reduction == "mean":
        denom = jnp.float32(n) if avg_factor is None else avg_factor
        total = total / denom
    return loss_weight * total


class B5IoULoss:
    """JAX/Pallas port of the PyTorch B5IoULoss module (forward only)."""

    def __init__(self, alpha=0.5, gamma=1.5, beta=1.0, eps=1e-6,
                 reduction="mean", loss_weight=1.0):
        self.alpha, self.gamma, self.beta = alpha, gamma, beta  # unused by the loss math
        self.eps = eps
        self.reduction = reduction
        self.loss_weight = loss_weight

    def __call__(self, encode_decode_preds, encode_decode_targets,
                 weight=None, avg_factor=None, reduction_override=None):
        assert len(encode_decode_preds) == len(encode_decode_targets) == 2
        encode_pred, decode_pred = encode_decode_preds
        _encode_target, decode_target = encode_decode_targets
        if weight is not None:
            try:
                all_nonpos = not bool(jnp.any(weight > 0))
            except jax.errors.ConcretizationTypeError:
                # TODO(synk): the data-dependent all-zero-weight early exit cannot
                # be evaluated on traced weights under jit; it is skipped there.
                all_nonpos = False
            if all_nonpos:
                return (encode_pred * weight).sum()
        assert reduction_override in (None, "none", "mean", "sum")
        reduction = reduction_override if reduction_override else self.reduction
        if weight is not None and weight.ndim > 1:
            assert weight.shape == encode_pred.shape
            weight = weight.mean(-1)
        return b5iou_loss_pallas(
            decode_pred, decode_target, weight,
            eps=self.eps, reduction=reduction, avg_factor=avg_factor,
            loss_weight=self.loss_weight)


def _b5iou_elem_ref(decode_pred, decode_target, eps=1e-6):
    """Pure-JAX per-element reference (mirrors the PyTorch math)."""
    area1 = (decode_pred[:, 2] - decode_pred[:, 0]) * (decode_pred[:, 3] - decode_pred[:, 1])
    area2 = (decode_target[:, 2] - decode_target[:, 0]) * (decode_target[:, 3] - decode_target[:, 1])
    lt = jnp.maximum(decode_pred[:, :2], decode_target[:, :2])
    rb = jnp.minimum(decode_pred[:, 2:], decode_target[:, 2:])
    wh = jnp.maximum(rb - lt, 0.0)
    overlap = wh[:, 0] * wh[:, 1]
    union = jnp.maximum(area1 + area2 - overlap, eps)
    ious = overlap / union
    log16 = math.log(16.0)
    return jnp.where(ious < 0.75,
                     1.0 - ious,
                     1.0 / log16 / 16.0 ** 0.75 * 16.0 ** ious - 2.0 * ious + 2.0 - 2.0 / log16)


if __name__ == "__main__":
    key = jax.random.PRNGKey(0)
    N = 2048  # number of boxes (small; exercises the 2-core grid path)

    k1, k2, k3, k4, k5, k6, k7 = jax.random.split(key, 7)
    # decoded boxes [x1, y1, x2, y2] with x2 >= x1, y2 >= y1
    p_xy = jax.random.uniform(k1, (N, 2), jnp.float32, 0.0, 10.0)
    p_wh = jax.random.uniform(k2, (N, 2), jnp.float32, 1.0, 5.0)
    decode_pred = jnp.concatenate([p_xy, p_xy + p_wh], axis=-1)

    t_xy = p_xy + jax.random.uniform(k3, (N, 2), jnp.float32, -1.0, 1.0)
    t_wh = p_wh + jax.random.uniform(k4, (N, 2), jnp.float32, -0.5, 0.5)
    decode_target = jnp.concatenate([t_xy, t_xy + jnp.maximum(t_wh, 0.5)], axis=-1)

    # encoded deltas (unused by the loss math, kept for interface fidelity)
    encode_pred = jax.random.normal(k5, (N, 4), jnp.float32)
    encode_target = jax.random.normal(k6, (N, 4), jnp.float32)

    loss_mod = B5IoULoss(reduction="mean", loss_weight=1.0)

    # 1) unweighted, N multiple of 128 (no weight stream, no mask compiled in)
    loss = loss_mod((encode_pred, decode_pred), (encode_target, decode_target))
    loss = jax.block_until_ready(loss)
    ref = jax.block_until_ready(_b5iou_elem_ref(decode_pred, decode_target).mean())
    np.testing.assert_allclose(np.asarray(loss), np.asarray(ref), rtol=1e-5, atol=1e-5)

    # 2) weighted, ragged N (exercises padding + zero-padded weight path)
    Nw = 200
    w = jax.random.uniform(k7, (Nw,), jnp.float32, 0.0, 2.0)
    loss_w = loss_mod((encode_pred[:Nw], decode_pred[:Nw]),
                      (encode_target[:Nw], decode_target[:Nw]), weight=w)
    loss_w = jax.block_until_ready(loss_w)
    ref_w = jax.block_until_ready(
        (_b5iou_elem_ref(decode_pred[:Nw], decode_target[:Nw]) * w).mean())
    np.testing.assert_allclose(np.asarray(loss_w), np.asarray(ref_w), rtol=1e-5, atol=1e-5)

    # 3) unweighted, ragged N (exercises the in-kernel iota mask + 2-core path)
    Nm = 1100
    loss_m = loss_mod((encode_pred[:Nm], decode_pred[:Nm]),
                      (encode_target[:Nm], decode_target[:Nm]))
    loss_m = jax.block_until_ready(loss_m)
    ref_m = jax.block_until_ready(
        _b5iou_elem_ref(decode_pred[:Nm], decode_target[:Nm]).mean())
    np.testing.assert_allclose(np.asarray(loss_m), np.asarray(ref_m), rtol=1e-5, atol=1e-5)

    print("KERNEL_OK")
</pallas_src>

<mosaic_0001>
module attributes {stable_mosaic.version = 11 : i64} {
  func.func @_b5iou_sum_kernel(%arg0: i32, %arg1: i32, %arg2: memref<8x8x128xf32, #tpu.memory_space<vmem>>, %arg3: memref<1x1x1xf32, #tpu.memory_space<vmem>>, %arg4: memref<8x128xf32, #tpu.memory_space<vmem>>) attributes {dimension_semantics = [#tpu.dimension_semantics<parallel>, #tpu.dimension_semantics<arbitrary>], iteration_bounds = array<i64: 2, 1>, scalar_prefetch = 0 : i64, scratch_operands = 1 : i64, tpu.core_type = #tpu.core_type<tc>, window_params = [{transform_indices = @transform_0, window_bounds = array<i64: 8, 8, 128>}, {transform_indices = @transform_1, window_bounds = array<i64: 1, 1, 1>}]} {
    %c0_i32 = arith.constant 0 : i32
    %0 = arith.cmpi eq, %arg1, %c0_i32 : i32
    %1 = arith.extui %0 : i1 to i32
    %c0_i32_0 = arith.constant 0 : i32
    %2 = arith.cmpi ne, %1, %c0_i32_0 : i32
    scf.if %2 {
      %cst_31 = arith.constant 0.000000e+00 : f32
      %62 = vector.broadcast %cst_31 : f32 to vector<8x128xf32>
      %c0_32 = arith.constant 0 : index
      %c0_33 = arith.constant 0 : index
      %63 = vector.load %arg4[%c0_32, %c0_33] : memref<8x128xf32, #tpu.memory_space<vmem>>, vector<8x128xf32>
      tpu.vector_store %arg4[%c0_32, %c0_33], %62 {strides = array<i32>} : memref<8x128xf32, #tpu.memory_space<vmem>>, vector<8x128xf32>,
    } else {
    }
    %c0 = arith.constant 0 : index
    %c0_1 = arith.constant 0 : index
    %c0_2 = arith.constant 0 : index
    %3 = vector.load %arg2[%c0, %c0_1, %c0_2] : memref<8x8x128xf32, #tpu.memory_space<vmem>>, vector<1x8x128xf32>
    %4 = vector.shape_cast %3 : vector<1x8x128xf32> to vector<8x128xf32>
    %c1 = arith.constant 1 : index
    %c0_3 = arith.constant 0 : index
    %c0_4 = arith.constant 0 : index
    %5 = vector.load %arg2[%c1, %c0_3, %c0_4] : memref<8x8x128xf32, #tpu.memory_space<vmem>>, vector<1x8x128xf32>
    %6 = vector.shape_cast %5 : vector<1x8x128xf32> to vector<8x128xf32>
    %c2 = arith.constant 2 : index
    %c0_5 = arith.constant 0 : index
    %c0_6 = arith.constant 0 : index
    %7 = vector.load %arg2[%c2, %c0_5, %c0_6] : memref<8x8x128xf32, #tpu.memory_space<vmem>>, vector<1x8x128xf32>
    %8 = vector.shape_cast %7 : vector<1x8x128xf32> to vector<8x128xf32>
    %c3 = arith.constant 3 : index
    %c0_7 = arith.constant 0 : index
    %c0_8 = arith.constant 0 : index
    %9 = vector.load %arg2[%c3, %c0_7, %c0_8] : memref<8x8x128xf32, #tpu.memory_space<vmem>>, vector<1x8x128xf32>
    %10 = vector.shape_cast %9 : vector<1x8x128xf32> to vector<8x128xf32>
    %c4 = arith.constant 4 : index
    %c0_9 = arith.constant 0 : index
    %c0_10 = arith.constant 0 : index
    %11 = vector.load %arg2[%c4, %c0_9, %c0_10] : memref<8x8x128xf32, #tpu.memory_space<vmem>>, vector<1x8x128xf32>
    %12 = vector.shape_cast %11 : vector<1x8x128xf32> to vector<8x128xf32>
    %c5 = arith.constant 5 : index
    %c0_11 = arith.constant 0 : index
    %c0_12 = arith.constant 0 : index
    %13 = vector.load %arg2[%c5, %c0_11, %c0_12] : memref<8x8x128xf32, #tpu.memory_space<vmem>>, vector<1x8x128xf32>
    %14 = vector.shape_cast %13 : vector<1x8x128xf32> to vector<8x128xf32>
    %c6 = arith.constant 6 : index
    %c0_13 = arith.constant 0 : index
    %c0_14 = arith.constant 0 : index
    %15 = vector.load %arg2[%c6, %c0_13, %c0_14] : memref<8x8x128xf32, #tpu.memory_space<vmem>>, vector<1x8x128xf32>
    %16 = vector.shape_cast %15 : vector<1x8x128xf32> to vector<8x128xf32>
    %c7 = arith.constant 7 : index
    %c0_15 = arith.constant 0 : index
    %c0_16 = arith.constant 0 : index
    %17 = vector.load %arg2[%c7, %c0_15, %c0_16] : memref<8x8x128xf32, #tpu.memory_space<vmem>>, vector<1x8x128xf32>
    %18 = vector.shape_cast %17 : vector<1x8x128xf32> to vector<8x128xf32>
    %19 = arith.subf %8, %4 : vector<8x128xf32>
    %20 = arith.subf %10, %6 : vector<8x128xf32>
    %21 = arith.mulf %19, %20 : vector<8x128xf32>
    %22 = arith.subf %16, %12 : vector<8x128xf32>
    %23 = arith.subf %18, %14 : vector<8x128xf32>
    %24 = arith.mulf %22, %23 : vector<8x128xf32>
    %25 = arith.maximumf %4, %12 : vector<8x128xf32>
    %26 = arith.maximumf %6, %14 : vector<8x128xf32>
    %27 = arith.minimumf %8, %16 : vector<8x128xf32>
    %28 = arith.minimumf %10, %18 : vector<8x128xf32>
    %29 = arith.subf %27, %25 : vector<8x128xf32>
    %cst = arith.constant 0.000000e+00 : f32
    %30 = vector.broadcast %cst : f32 to vector<8x128xf32>
    %31 = arith.maximumf %29, %30 : vector<8x128xf32>
    %32 = arith.subf %28, %26 : vector<8x128xf32>
    %cst_17 = arith.constant 0.000000e+00 : f32
    %33 = vector.broadcast %cst_17 : f32 to vector<8x128xf32>
    %34 = arith.maximumf %32, %33 : vector<8x128xf32>
    %35 = arith.mulf %31, %34 : vector<8x128xf32>
    %36 = arith.addf %21, %24 : vector<8x128xf32>
    %37 = arith.subf %36, %35 : vector<8x128xf32>
    %cst_18 = arith.constant 9.99999997E-7 : f32
    %38 = vector.broadcast %cst_18 : f32 to vector<8x128xf32>
    %39 = arith.maximumf %37, %38 : vector<8x128xf32>
    %40 = arith.divf %35, %39 : vector<8x128xf32>
    %cst_19 = arith.constant 2.77258873 : f32
    %41 = vector.broadcast %cst_19 : f32 to vector<8x128xf32>
    %42 = arith.mulf %40, %41 : vector<8x128xf32>
    %43 = math.exp %42 : vector<8x128xf32>
    %cst_20 = arith.constant 7.500000e-01 : f32
    %44 = vector.broadcast %cst_20 : f32 to vector<8x128xf32>
    %45 = arith.cmpf olt, %40, %44 : vector<8x128xf32>
    %cst_21 = arith.constant 1.000000e+00 : f32
    %46 = vector.broadcast %cst_21 : f32 to vector<8x128xf32>
    %47 = arith.subf %46, %40 : vector<8x128xf32>
    %cst_22 = arith.constant 0.0450842194 : f32
    %48 = vector.broadcast %cst_22 : f32 to vector<8x128xf32>
    %49 = arith.mulf %48, %43 : vector<8x128xf32>
    %cst_23 = arith.constant 2.000000e+00 : f32
    %50 = vector.broadcast %cst_23 : f32 to vector<8x128xf32>
    %51 = arith.mulf %50, %40 : vector<8x128xf32>
    %52 = arith.subf %49, %51 : vector<8x128xf32>
    %cst_24 = arith.constant 1.27865243 : f32
    %53 = vector.broadcast %cst_24 : f32 to vector<8x128xf32>
    %54 = arith.addf %52, %53 : vector<8x128xf32>
    %55 = arith.select %45, %47, %54 : vector<8x128xi1>, vector<8x128xf32>
    %c0_25 = arith.constant 0 : index
    %c0_26 = arith.constant 0 : index
    %56 = vector.load %arg4[%c0_25, %c0_26] : memref<8x128xf32, #tpu.memory_space<vmem>>, vector<8x128xf32>
    %57 = arith.addf %56, %55 : vector<8x128xf32>
    %c0_27 = arith.constant 0 : index
    %c0_28 = arith.constant 0 : index
    %58 = vector.load %arg4[%c0_27, %c0_28] : memref<8x128xf32, #tpu.memory_space<vmem>>, vector<8x128xf32>
    tpu.vector_store %arg4[%c0_27, %c0_28], %57 {strides = array<i32>} : memref<8x128xf32, #tpu.memory_space<vmem>>, vector<8x128xf32>,
    %c0_i32_29 = arith.constant 0 : i32
    %59 = arith.cmpi eq, %arg1, %c0_i32_29 : i32
    %60 = arith.extui %59 : i1 to i32
    %c0_i32_30 = arith.constant 0 : i32
    %61 = arith.cmpi ne, %60, %c0_i32_30 : i32
    scf.if %61 {
      %c0_31 = arith.constant 0 : index
      %c0_32 = arith.constant 0 : index
      %62 = vector.load %arg4[%c0_31, %c0_32] : memref<8x128xf32, #tpu.memory_space<vmem>>, vector<8x128xf32>
      %cst_33 = arith.constant dense<0.000000e+00> : vector<128xf32>
      %63 = vector.multi_reduction <add>, %62, %cst_33 [0] : vector<8x128xf32> to vector<128xf32>
      %64 = vector.shape_cast %63 : vector<128xf32> to vector<1x128xf32>
      %cst_34 = arith.constant dense<0.000000e+00> : vector<1xf32>
      %65 = vector.multi_reduction <add>, %64, %cst_34 [1] : vector<1x128xf32> to vector<1xf32>
      %66 = vector.shape_cast %65 : vector<1xf32> to vector<1x1xf32>
      %c0_35 = arith.constant 0 : index
      %c0_36 = arith.constant 0 : index
      %c0_37 = arith.constant 0 : index
      %67 = vector.load %arg3[%c0_35, %c0_36, %c0_37] : memref<1x1x1xf32, #tpu.memory_space<vmem>>, vector<1x1x1xf32>
      %68 = vector.shape_cast %67 : vector<1x1x1xf32> to vector<1x1xf32>
      %69 = vector.shape_cast %66 : vector<1x1xf32> to vector<1x1x1xf32>
      tpu.vector_store %arg3[%c0_35, %c0_36, %c0_37], %69 {strides = array<i32>} : memref<1x1x1xf32, #tpu.memory_space<vmem>>, vector<1x1x1xf32>,
    } else {
    }
    return
  }
  func.func @transform_0(%arg0: i32, %arg1: i32) -> (i32, i32, i32) {
    %c1_i32 = arith.constant 1 : i32
    %0 = arith.muli %arg0, %c1_i32 : i32
    %1 = arith.addi %0, %arg1 : i32
    %c0_i32 = arith.constant 0 : i32
    %c0_i32_0 = arith.constant 0 : i32
    %c0_i32_1 = arith.constant 0 : i32
    return %c0_i32, %1, %c0_i32_0 : i32, i32, i32
  }
  func.func @transform_1(%arg0: i32, %arg1: i32) -> (i32, i32, i32) {
    %c0_i32 = arith.constant 0 : i32
    %c0_i32_0 = arith.constant 0 : i32
    %c0_i32_1 = arith.constant 0 : i32
    return %arg0, %c0_i32, %c0_i32_0 : i32, i32, i32
  }
}

</mosaic_0001>

<bundles_post_ra>
// kernel: tpu_custom_call.1
= control target key start
LH: loop header
LB: loop body
LE: loop exit
PB: predicated region body
PF: predicated region fallthrough
CT: control target
= control target key end

     0   :  { %6 = vsyncpa [#allocation4], 0  ;;  %s584_s0 = inlined_call_operand.hbm [shape: f32[8,16,128], index: 0, kind: input, shape index: {}]   ;;  %s585_s1 = inlined_call_operand.vmem [shape: f32[2,1,1], index: 1, kind: output, shape index: {}]  }
   0x1   :  { %8 = vsyncpa [#allocation4 + $0x1], 0  ;;  %s458_s6 = smov 0   ;;  %s460_s7 = smov 0  }
   0x2   :  { %s462_s8 = smov 0   ;;  %s464_s9 = smov 0  }
   0x3   :  { %s466_s10 = smov 0   ;;  %s468_s11 = smov 0  }
   0x4 LB: > { %s283_s12 = sadd.s32 4294967295, %s442_s11   ;;  %s26_s13 = sadd.s32 1, %s438_s10  ;;  %s442_s11 = sphi %s468_s11, %s14_s11   ;;  %s438_s10 = sphi %s466_s10, %s594_s10   ;;  %s434_s9 = sphi %s464_s9, %s593_s9   ;;  %s430_s8 = sphi %s462_s8, %s592_s8   ;;  %s426_s7 = sphi %s460_s7, %s591_s7   ;;  %s422_s6 = sphi %s458_s6, %s590_s6  }
   0x5   : > { %p28_p0 = scmp.ge.s32.totalorder %s26_s13, 2  ;;  %s35_s14 = sadd.s32 1, %s430_s8 }
   0x6   : > { %p42_p1 = scmp.ne.s32.totalorder %s430_s8, %s426_s7  ;;  %p43_p2 = scmp.eq.s32.totalorder %s442_s11, 0 }
   0x7   : > { %s596_s13 = smov (%p28_p0, %s26_s13), 0  ;;  %p48_p4 = scmp.ne.s32.totalorder %s426_s7, %s422_s6 }
   0x8   : > { %p494_p3 = por %p43_p2, %p42_p1  ;;  %s32_s16 = ssub.s32 %s438_s10, %s596_s13 }
   0x9   : > { %p49_p5 = scmp.eq.s32.totalorder %s283_s12, 0  ;;  %p33_p6 = scmp.eq.s32.totalorder %s32_s16, 0 }
   0xa   : > { %p306_p8 = scmp.lt.s32.totalorder %s442_s11, 2  ;;  %s98_s19 = sand.u32 1, %s430_s8  }
   0xb   : > { %p501_p7 = por %p49_p5, %p48_p4  ;;  %s288_s20 = sshll.u32 %s438_s10, 7 }
   0xc   : > { %s507_s18 = scalar_select %p33_p6, %s430_s8, %s35_s14  }
   0xd   : > { %s287_s21 = sshll.u32 %s98_s19, 6  ;;  %s514_s24 = scalar_lea.hbm %s584_s0, %s288_s20 }
   0xe   : > { %s102_s25 = scalar_lea.vmem [#allocation3], %s287_s21  ;;  %p518_p9 = pnand %p306_p8, %p494_p3 }
   0xf   : > { %s109_s26 = sshll.u32 %s102_s25, 4  ;;  %s525_s28 = scalar_lea.sflag [#allocation4], %s98_s19  ;;  %s522_s26 = int_to_ptr.vmem [resolvable:$true] %s109_s26 }
  0x10   : > { %s362_s29 = scalar_lea.hbm %s514_s24, 1024  ;;  %p364_p12 = pneg %p518_p9 }
  0x11   : > { %p363_p11 = scmp.ne.s32.totalorder %s514_s24, %s362_s29  ;;  %s367_s3 = scalar_lea.hbm %s584_s0, 2048 }
  0x12   : > { %p368_p1 = scmp.lt.u32.totalorder %s514_s24, %s584_s0  ;;  %p369_p2 = scmp.lt.u32.totalorder %s367_s3, %s362_s29 }
  0x13   : > { %p365_p13 = pnand %p364_p12, %p363_p11  ;;  %p371_p4 = scmp.lt.u32.totalorder %s362_s29, %s514_s24 }
  0x14   : > { %p370_p3 = por %p369_p2, %p368_p1 }
  0x15   : > { %p366_p0 = pneg %p365_p13 }
  0x16   : > { %p372_p5 = por %p371_p4, %p370_p3 }
  0x18   : > { %p373_p6 = pnand %p372_p5, %p366_p0 }
  0x1a   : > { %376 = shalt.err (!%p373_p6)
}
  0x1b   : > { %s377_s6 = scalar_lea.vmem %s522_s26, 1024  ;;  %s444_s12 = smov [#allocation3]  }
  0x1c   : > { %p378_p8 = scmp.ne.s32.totalorder %s522_s26, %s377_s6  ;;  %s382_s14 = sshll.u32 %s444_s12, 4  ;;  %s383_s14 = int_to_ptr.vmem [resolvable:$false] %s382_s14 }
  0x1d   : > { %s384_s15 = scalar_lea.vmem %s383_s14, 2048  ;;  %p385_p10 = scmp.lt.s32.totalorder %s522_s26, %s383_s14 }
  0x1e   : > { %p380_p11 = pnand %p378_p8, %p364_p12  ;;  %p386_p1 = scmp.lt.s32.totalorder %s384_s15, %s377_s6 }
  0x20   : > { %p381_p13 = pneg %p380_p11  ;;  %p387_p2 = por %p386_p1, %p385_p10 }
  0x22   : > { %p388_p3 = pnand %p387_p2, %p381_p13 }
  0x24   : > { %391 = shalt.err (!%p388_p3)
}
  0x25   : > { %s445_s16 = smov 256   ;;  %s446_s19 = smov 128  }
  0x26   : > { %s447_s20 = smov 8   ;;  %p117_p12 = scmp.lt.s32.totalorder %s442_s11, 3 }
  0x27   : > { %305 = dma.hbm_to_vmem [thread:$0]  (!%p518_p9), %s514_s24, 1024, %s522_s26, %s525_s28, %s445_s16, %s446_s19, %s447_s20  }
  0x28   : > { %p589_p0 = scmp.ge.s32.totalorder %s442_s11, 1 }
  0x2a   : > { %p118_p4 = pnand %p589_p0, %p117_p12 }
  0x2b   : > { %s123_s21 = sand.u32 (!%p118_p4), 1, %s426_s7  }
  0x2c   : > { %121 = sbr.rel (%p118_p4) target bundleno = 258 (0x102), region = 24  ;;  %s290_s22 = sshll.u32 (!%p118_p4), %s123_s21, 6 }
  0x2d   : > { %s124_s23 = scalar_lea.sflag (!%p118_p4), [#allocation4], %s123_s21  ;;  %s127_s25 = scalar_lea.vmem (!%p118_p4), [#allocation3], %s290_s22 }
  0x33   : > { %417 = dma.done.wait (%p501_p7), %s124_s23, 1024  }
  0x34   : > { %419 = vsyncadd (%p501_p7), %s124_s23, 4294966272  ;;  %v153_v0 = vld [vmem:[%s127_s25] sm:$0xff]  ;;  %v291_v1 = vld [vmem:[%s127_s25 + $0x8] sm:$0xff]  ;;  %p145_p7 = scmp.lt.s32.totalorder %s434_s9, 1  ;;  %vm213_vm1 = vcmask 0  }
  0x35   : > { %v292_v2 = vld [vmem:[%s127_s25 + $0x10] sm:$0xff]  ;;  %v293_v3 = vld [vmem:[%s127_s25 + $0x18] sm:$0xff]  ;;  %v294_v4 = vld [vmem:[%s127_s25 + $0x20] sm:$0xff] }
  0x36   : > { %v295_v5 = vld [vmem:[%s127_s25 + $0x28] sm:$0xff]  ;;  %v168_v6 = vsub.f32 %v292_v2, %v153_v0  ;;  %v296_v7 = vld [vmem:[%s127_s25 + $0x30] sm:$0xff]  ;;  %v297_v8 = vld [vmem:[%s127_s25 + $0x38] sm:$0xff]  ;;  %v169_v9 = vsub.f32 %v293_v3, %v291_v1  ;;  %v174_v10 = vmax.f32 %v153_v0, %v294_v4  ;;  %s598_s9 = smov (!%p145_p7, %s434_s9), 1 }
  0x37   : > { %v175_v11 = vmax.f32 %v291_v1, %v295_v5  ;;  %v171_v12 = vsub.f32 %v296_v7, %v294_v4  ;;  %v172_v13 = vsub.f32 %v297_v8, %v295_v5  ;;  %v176_v14 = vmin.f32 %v292_v2, %v296_v7  ;;  %s147_s26 = scalar_lea.vmem %s585_s1, %s598_s9 }
  0x38   : > { %v177_v15 = vmin.f32 %v293_v3, %v297_v8  ;;  %v170_v16 = vmul.f32 %v169_v9, %v168_v6 }
  0x39   : > { %v173_v17 = vmul.f32 %v172_v13, %v171_v12  ;;  %v178_v18 = vsub.f32 %v176_v14, %v174_v10 }
  0x3a   : > { %v180_v19 = vsub.f32 %v177_v15, %v175_v11 }
  0x3b   : > { %v179_v20 = vmax.f32 %v178_v18, 0.0  ;;  %v183_v22 = vadd.f32 %v173_v17, %v170_v16 }
  0x3c   : > { %v181_v21 = vmax.f32 %v180_v19, 0.0 }
  0x3e   : > { %v182_v23 = vmul.f32 %v181_v21, %v179_v20 }
  0x40   : > { %v184_v24 = vsub.f32 %v183_v22, %v182_v23 }
  0x42   : > { %v185_v25 = vmax.f32 %v184_v24, 1e-06 }
  0x44   : > { %358 = vrcp.f32 %v185_v25 }
  0x4e   : > { %v359_v26 = vpop.eup %358 }
  0x4f   : > { %v187_v27 = vmul.f32 %v359_v26, %v182_v23 }
  0x51   : > { %v188_v28 = vmul.f32 2.7725887, %v187_v27  ;;  %v194_v30 = vmul.f32 2.0, %v187_v27  ;;  %v192_v33 = vsub.f32 1.0, %v187_v27  ;;  %vm191_vm0 = vcmp.lt.f32.partialorder %v187_v27, 0.75 }
  0x53   : > { %v189_v29 = vmul.f32 1.442695, %v188_v28 }
  0x55   : > { %360 = vpow2.f32 %v189_v29 }
  0x5f   : > { %v361_v31 = vpop.eup %360 }
  0x60   : > { %v193_v32 = vmul.f32 0.04508422, %v361_v31 }
  0x62   : > { %v195_v34 = vsub.f32 %v193_v32, %v194_v30 }
  0x64   : > { %v196_v35 = vadd.f32 1.2786524, %v195_v34 }
  0x66   : > { %v197_v36 = vsel %vm191_vm0, %v192_v33, %v196_v35 }
  0x67   : > { %v205_v37 = vrot.slane %v197_v36, 4 }
  0x69   : > { %v206_v38 = vadd.f32 %v205_v37, %v197_v36 }
  0x6b   : > { %v207_v39 = vrot.slane %v206_v38, 2 }
  0x6d   : > { %v208_v40 = vadd.f32 %v207_v39, %v206_v38 }
  0x6f   : > { %v209_v41 = vrot.slane %v208_v40, 1 }
  0x71   : > { %v210_v42 = vadd.f32 %v209_v41, %v208_v40 }
  0x73   : > { %211 = vadd.xlane.f32.xlu0 %v210_v42 }
 0x100   : > { %v212_v43 = vpop.xlane.xlu0 %211 }
 0x101   : > { %214 = vst.msk [vmem:[%s147_s26] sm:$0x1] %vm213_vm1, %v212_v43 }
 0x102 PF: > { %s14_s11 = sadd.s32 1, %s442_s11   ;;  %s590_s6 = smov %s426_s7 }
 0x103   : > { %p11_p9 = scmp.ge.s32.totalorder %s14_s11, 4   ;;  %s591_s7 = smov %s430_s8 }
 0x104   : > { %s592_s8 = smov %s507_s18  ;;  %s593_s9 = smov %s438_s10 }
 0x105   : > { %s594_s10 = smov %s596_s13  ;;  %13 = sbr.rel (!%p11_p9) target bundleno = 4 (0x4), region = 79 }
 0x10c   :  { %232 = vsyncpa [#allocation4], 1 }
 0x10d   :  { %234 = vsyncpa [#allocation4 + $0x1], 1 }

</bundles_post_ra>
